<compile_context>
chip_gen: v5e
topology: v5e:2x2
jax: 0.10.0
libtpu: 0.0.40
codegen_flags: <defaults>
</compile_context>

<pallas_src>
import functools

import jax
import jax.numpy as jnp
import numpy as np
from jax import lax
from jax.experimental import pallas as pl
from jax.experimental.pallas import tpu as pltpu

LANE = 128                      # lane width / padded embedding chunk
COMPUTE_DTYPE = jnp.bfloat16    # MXU operand dtype (f32 accumulation)


def _round_up(x, m):
    return ((x + m - 1) // m) * m


def _vmem_limit_bytes():
    """Per-chip scoped VMEM budget (leave ~1/4 headroom; v7x has 64 MiB phys)."""
    cap = None
    try:
        cap = getattr(pltpu.get_tpu_info(), "vmem_capacity_bytes", None)
    except Exception:
        cap = None
    if not cap:
        cap = 64 * 1024 * 1024
    return int(min(cap * 3 // 4, 96 * 1024 * 1024))


def _mish_fast(x, *, approx_recip):
    """mish(x) = x*tanh(softplus(x)) = x*u*(u+2)/(u*(u+2)+2), u=exp(x).
    One exp + one reciprocal (EUP) instead of ~3 transcendentals."""
    u = jnp.exp(x)
    t = u * (u + 2.0)
    d = t + 2.0
    r = pl.reciprocal(d, approx=True) if approx_recip else 1.0 / d
    y = x * t * r
    # exp overflow for large x -> NaN in y; mish(x) ~= x there.
    return jnp.where(x > 20.0, x, y)


# ----------------------------------------------------------------------------
# Zero-padding helpers (lane-dense layouts; zero pads are numerically exact)
# ----------------------------------------------------------------------------
def _pad_axis(a, axis, new_size):
    pad = new_size - a.shape[axis]
    if pad <= 0:
        return a
    widths = [(0, 0)] * a.ndim
    widths[axis] = (0, pad)
    return jnp.pad(a, widths)


def _chunk_pad_axis(a, axis, chunk, chunk_pad):
    """Split `axis` (size n*chunk) into n chunks, zero-pad each to chunk_pad."""
    shape = list(a.shape)
    n = shape[axis] // chunk
    a = a.reshape(shape[:axis] + [n, chunk] + shape[axis + 1:])
    a = _pad_axis(a, axis + 1, chunk_pad)
    return a.reshape(shape[:axis] + [n * chunk_pad] + shape[axis + 1:])


# ----------------------------------------------------------------------------
# Kernel 1: per-relation residual MLP   y = x + outer(mish(inner(x)))
#           x is bf16 in, messages are bf16 out; f32 accumulation throughout.
# ----------------------------------------------------------------------------
def _relation_mlp_kernel(x_ref, w1_ref, b1_ref, w2_ref, b2_ref, o_ref):
    x = x_ref[...]                                               # bf16 (TM, Din_pad)
    h = jnp.dot(x, w1_ref[...], preferred_element_type=jnp.float32) + b1_ref[...]
    h = _mish_fast(h, approx_recip=True)                        # f32
    y = jnp.dot(h.astype(COMPUTE_DTYPE), w2_ref[...],
                preferred_element_type=jnp.float32) + b2_ref[...]
    o_ref[...] = (y + x).astype(o_ref.dtype)                    # residual, bf16 store


def relation_mlp_pallas(x, w1_pad, b1_pad, w2_pad, b2_pad):
    """x: (T, Din_pad) bf16 (lane-padded). Returns (T, Dout_pad) bf16 messages."""
    t, din_pad = x.shape
    h_pad = w1_pad.shape[1]
    dout_pad = w2_pad.shape[1]

    # Large row tile (mem-bound: 85%+ of HBM roofline at 512-1024).
    # TODO(synk): on v7x, split the row axis into >=2 blocks for mid-size T so
    # both TensorCores get work (best fixed by batching all relations into one
    # pallas_call with scalar-prefetched row offsets / weight ids).
    tm = min(1024, _round_up(t, 16))        # 16: bf16 sublane packing
    t_pad = _round_up(t, tm)
    x_pad = _pad_axis(x, 0, t_pad)

    y_pad = pl.pallas_call(
        _relation_mlp_kernel,
        out_shape=jax.ShapeDtypeStruct((t_pad, dout_pad), COMPUTE_DTYPE),
        grid_spec=pltpu.PrefetchScalarGridSpec(
            num_scalar_prefetch=0,
            grid=(t_pad // tm,),
            in_specs=[
                pl.BlockSpec((tm, din_pad), lambda i: (i, 0)),       # x rows (bf16)
                pl.BlockSpec((din_pad, h_pad), lambda i: (0, 0)),    # W1 resident
                pl.BlockSpec((1, h_pad), lambda i: (0, 0)),          # b1
                pl.BlockSpec((h_pad, dout_pad), lambda i: (0, 0)),   # W2 resident
                pl.BlockSpec((1, dout_pad), lambda i: (0, 0)),       # b2
            ],
            out_specs=pl.BlockSpec((tm, dout_pad), lambda i: (i, 0)),
        ),
        compiler_params=pltpu.CompilerParams(
            dimension_semantics=("parallel",),
            vmem_limit_bytes=_vmem_limit_bytes()),
    )(x_pad, w1_pad, b1_pad, w2_pad, b2_pad)
    return y_pad[:t]


# ----------------------------------------------------------------------------
# Kernel 2: mean aggregation (one-hot scatter matmul, tiled over messages)
#           fused with the update MLP on cat(avg_msg, node_embeddings).
#           Counts come for free from a ones pad-lane of the messages.
# ----------------------------------------------------------------------------
def _agg_update_kernel(cnt_lane, idx_ref, msg_ref, emb_ref, w1a_ref, w1b_ref,
                       b1_ref, w2_ref, b2_ref, o_ref, sum_acc):
    k = pl.program_id(1)
    n_tile = sum_acc.shape[0]
    m_tile = idx_ref.shape[1]

    @pl.when(k == 0)
    def _():
        sum_acc[...] = jnp.zeros_like(sum_acc)

    # One-hot scatter block for this (node-tile, message-tile), built in bf16.
    node0 = pl.program_id(0) * n_tile
    node_ids = lax.broadcasted_iota(jnp.int32, (n_tile, m_tile), 0) + node0
    onehot = (node_ids == idx_ref[...]).astype(COMPUTE_DTYPE)    # (Nt, Mt) bf16
    # Messages carry a 1.0 in pad lane `cnt_lane`, so this matmul also
    # accumulates exact f32 counts in that column (exact up to 2^24 msgs/node).
    sum_acc[...] += jnp.dot(onehot, msg_ref[...],
                            preferred_element_type=jnp.float32)

    @pl.when(k == pl.num_programs(1) - 1)
    def _():
        s = sum_acc[...]
        cnt = s[:, cnt_lane:cnt_lane + 1]           # counts from the ones lane
        avg = s / cnt                               # 0/0 -> NaN, as in torch
        emb = emb_ref[...]
        # Fused update MLP on cat(avg, emb): split inner weight, no concat.
        h = (jnp.dot(avg.astype(COMPUTE_DTYPE), w1a_ref[...],
                     preferred_element_type=jnp.float32)
             + jnp.dot(emb.astype(COMPUTE_DTYPE), w1b_ref[...],
                       preferred_element_type=jnp.float32)
             + b1_ref[...])
        h = _mish_fast(h, approx_recip=True)
        o_ref[...] = jnp.dot(h.astype(COMPUTE_DTYPE), w2_ref[...],
                             preferred_element_type=jnp.float32) + b2_ref[...]


def mean_aggregate_update_pallas(indices, messages, emb_pad,
                                 w1a, w1b, b1, w2, b2, *, cnt_lane):
    """messages: (M, E_pad) bf16, indices: (M,) i32, emb_pad: (N, E_pad) f32.
    Returns update_mlp(cat(mean_agg(messages, indices), emb)) as (N, E_pad) f32."""
    n, e_pad = emb_pad.shape
    m = messages.shape[0]
    h_pad = w1a.shape[1]
    assert m < (1 << 24), "count-in-matmul trick exact only up to 2^24 messages"

    # Large tiles: each message tile is re-read N_pad/n_tile times, so a big
    # node tile is the main HBM lever.  Total double-buffered VMEM ~ a few MB.
    n_tile = min(1024, _round_up(n, 8))
    n_pad = _round_up(n, n_tile)
    m_tile = min(1024, _round_up(m, LANE))
    m_pad = _round_up(m, m_tile)

    emb_p = _pad_axis(emb_pad, 0, n_pad)
    msg_p = _pad_axis(messages, 0, m_pad)                       # zero rows for pads
    # Ones in a known-zero pad lane -> the scatter matmul also produces counts.
    real = (jnp.arange(m_pad) < m).astype(messages.dtype)
    msg_p = msg_p.at[:, cnt_lane].set(real)
    idx_p = jnp.full((1, m_pad), -1, jnp.int32)                 # -1 matches no node
    idx_p = idx_p.at[0, :m].set(indices.astype(jnp.int32))

    # TODO(synk): for non-toy graphs, bucket messages by destination node tile
    # host-side and use scalar-prefetched per-tile offsets (data-dependent
    # index_map / pl.when skip) so each node tile only touches its own message
    # blocks instead of the dense O(N*M) one-hot matmul.
    out = pl.pallas_call(
        functools.partial(_agg_update_kernel, cnt_lane),
        out_shape=jax.ShapeDtypeStruct((n_pad, e_pad), jnp.float32),
        grid_spec=pltpu.PrefetchScalarGridSpec(
            num_scalar_prefetch=0,
            grid=(n_pad // n_tile, m_pad // m_tile),
            in_specs=[
                pl.BlockSpec((1, m_tile), lambda i, k: (0, k)),       # indices
                pl.BlockSpec((m_tile, e_pad), lambda i, k: (k, 0)),   # messages bf16
                pl.BlockSpec((n_tile, e_pad), lambda i, k: (i, 0)),   # embeddings
                pl.BlockSpec((LANE, h_pad), lambda i, k: (0, 0)),     # W1 (avg half)
                pl.BlockSpec((LANE, h_pad), lambda i, k: (0, 0)),     # W1 (emb half)
                pl.BlockSpec((1, h_pad), lambda i, k: (0, 0)),        # b1
                pl.BlockSpec((h_pad, e_pad), lambda i, k: (0, 0)),    # W2
                pl.BlockSpec((1, e_pad), lambda i, k: (0, 0)),        # b2
            ],
            out_specs=pl.BlockSpec((n_tile, e_pad), lambda i, k: (i, 0)),
            scratch_shapes=[pltpu.VMEM((n_tile, e_pad), jnp.float32)],  # sum+cnt acc
        ),
        compiler_params=pltpu.CompilerParams(
            dimension_semantics=("parallel", "arbitrary"),
            vmem_limit_bytes=_vmem_limit_bytes()),
    )(idx_p, msg_p, emb_p, w1a, w1b, b1, w2, b2)
    return out[:n]


# ----------------------------------------------------------------------------
# Parameter init (PyTorch-Linear-like uniform bounds) + lane padding
# ----------------------------------------------------------------------------
def _init_linear(key, din, dout):
    k1, k2 = jax.random.split(key)
    bound = 1.0 / np.sqrt(din)
    w = jax.random.uniform(k1, (din, dout), jnp.float32, -bound, bound)
    b = jax.random.uniform(k2, (dout,), jnp.float32, -bound, bound)
    return w, b


def init_params(key, embedding_size, relation_arities):
    params = {"relations": {}, "update": None}
    for name in sorted(relation_arities):
        d = relation_arities[name] * embedding_size
        key, k1, k2 = jax.random.split(key, 3)
        w1, b1 = _init_linear(k1, d, d)        # MLP._inner
        w2, b2 = _init_linear(k2, d, d)        # MLP._outer
        params["relations"][name] = (w1, b1, w2, b2)
    key, k1, k2 = jax.random.split(key, 3)
    uw1, ub1 = _init_linear(k1, 2 * embedding_size, 2 * embedding_size)
    uw2, ub2 = _init_linear(k2, 2 * embedding_size, embedding_size)
    params["update"] = (uw1, ub1, uw2, ub2)
    return params


def prepare_padded_params(params, relation_arities, embedding_size):
    """Zero-pad weights to lane-dense shapes; pre-cast MXU operands to bf16."""
    e = embedding_size
    padded = {"relations": {}, "update": None}
    for name, (w1, b1, w2, b2) in params["relations"].items():
        d = relation_arities[name] * e
        h_pad = _round_up(d, LANE)
        # inner: rows follow the chunked (E -> LANE) input layout, cols contiguous
        w1p = _pad_axis(_chunk_pad_axis(w1, 0, e, LANE), 1, h_pad).astype(COMPUTE_DTYPE)
        b1p = _pad_axis(b1, 0, h_pad).reshape(1, h_pad)
        # outer: rows contiguous (hidden), cols follow the chunked output layout
        w2p = _chunk_pad_axis(_pad_axis(w2, 0, h_pad), 1, e, LANE).astype(COMPUTE_DTYPE)
        b2p = _chunk_pad_axis(b2, 0, e, LANE).reshape(1, -1)
        padded["relations"][name] = (w1p, b1p, w2p, b2p)

    uw1, ub1, uw2, ub2 = params["update"]
    h_pad = _round_up(2 * e, LANE)
    # split inner weight by input halves (avg | emb) -> no concat needed in-kernel
    uw1a = _pad_axis(_pad_axis(uw1[:e], 0, LANE), 1, h_pad).astype(COMPUTE_DTYPE)
    uw1b = _pad_axis(_pad_axis(uw1[e:], 0, LANE), 1, h_pad).astype(COMPUTE_DTYPE)
    ub1p = _pad_axis(ub1, 0, h_pad).reshape(1, h_pad)
    uw2p = _pad_axis(_pad_axis(uw2, 0, h_pad), 1, LANE).astype(COMPUTE_DTYPE)
    ub2p = _pad_axis(ub2, 0, LANE).reshape(1, LANE)
    padded["update"] = (uw1a, uw1b, ub1p, uw2p, ub2p)
    return padded


# ----------------------------------------------------------------------------
# Forward pass = MeanRelationMessagePassing.forward
# ----------------------------------------------------------------------------
def mean_relation_message_passing(params_padded, relation_arities, embedding_size,
                                  node_embeddings, relations):
    e = embedding_size
    assert e < LANE, "count-lane trick needs a spare pad lane"  # TODO(synk): E==128
    emb_pad = _pad_axis(node_embeddings, 1, LANE)               # (N, 128) f32
    emb_b16 = emb_pad.astype(COMPUTE_DTYPE)                     # bf16 gather source

    msgs_list, idx_list = [], []
    # TODO(synk): fuse all per-relation MLPs (and the index_select gather) into
    # a single PrefetchScalarGridSpec kernel with per-relation row offsets /
    # weight ids in SMEM to amortise launch overhead at small tuple counts and
    # feed both v7x TensorCores.
    for name in sorted(params_padded["relations"]):             # ModuleDict order
        if name in relations:
            arity = relation_arities[name]
            idx = relations[name]
            # index_select + view(-1, arity*E)   (XLA glue, lane-padded, bf16)
            x = jnp.take(emb_b16, idx, axis=0).reshape(-1, arity * LANE)
            w1p, b1p, w2p, b2p = params_padded["relations"][name]
            y = relation_mlp_pallas(x, w1p, b1p, w2p, b2p)      # x + mlp(x), bf16
            msgs_list.append(y.reshape(-1, LANE))
            idx_list.append(idx.astype(jnp.int32))
    messages = jnp.concatenate(msgs_list, axis=0)               # (M, 128) bf16
    indices = jnp.concatenate(idx_list, axis=0)                 # (M,)

    uw1a, uw1b, ub1p, uw2p, ub2p = params_padded["update"]
    out = mean_aggregate_update_pallas(indices, messages, emb_pad,
                                       uw1a, uw1b, ub1p, uw2p, ub2p,
                                       cnt_lane=e)
    return out[:, :e]


# ----------------------------------------------------------------------------
# References
# ----------------------------------------------------------------------------
def ref_forward(params, relation_arities, embedding_size, node_embeddings, relations):
    """Pure-f32 mirror of the PyTorch forward (tanh/softplus mish)."""
    def mish(x):
        return x * jnp.tanh(jnp.logaddexp(x, 0.0))

    msgs_list, idx_list = [], []
    for name in sorted(params["relations"]):
        if name in relations:
            d = relation_arities[name] * embedding_size
            idx = relations[name]
            x = jnp.take(node_embeddings, idx, axis=0).reshape(-1, d)
            w1, b1, w2, b2 = params["relations"][name]
            y = x + (mish(x @ w1 + b1) @ w2 + b2)
            msgs_list.append(y.reshape(-1, embedding_size))
            idx_list.append(idx)
    messages = jnp.concatenate(msgs_list, axis=0)
    indices = jnp.concatenate(idx_list, axis=0)
    sum_msg = jnp.zeros_like(node_embeddings).at[indices].add(messages)
    cnt_msg = jnp.zeros_like(node_embeddings).at[indices].add(jnp.ones_like(messages))
    avg_msg = sum_msg / cnt_msg
    uw1, ub1, uw2, ub2 = params["update"]
    x = jnp.concatenate([avg_msg, node_embeddings], axis=1)
    return mish(x @ uw1 + ub1) @ uw2 + ub2


def mirror_forward(params, relation_arities, embedding_size, node_embeddings, relations):
    """Same math as the kernels (bf16 x / messages / MXU operands, f32
    accumulation, fast mish) for a tight correctness check."""
    c = COMPUTE_DTYPE
    e = embedding_size

    def bdot(a, b):
        return jnp.dot(a.astype(c), b.astype(c), preferred_element_type=jnp.float32)

    emb_b = node_embeddings.astype(c)
    msgs_list, idx_list = [], []
    for name in sorted(params["relations"]):
        if name in relations:
            d = relation_arities[name] * e
            idx = relations[name]
            x = jnp.take(emb_b, idx, axis=0).reshape(-1, d)          # bf16
            w1, b1, w2, b2 = params["relations"][name]
            h = _mish_fast(bdot(x, w1) + b1, approx_recip=False)
            y = (bdot(h, w2) + b2 + x.astype(jnp.float32)).astype(c)  # bf16 messages
            msgs_list.append(y.reshape(-1, e))
            idx_list.append(idx)
    messages = jnp.concatenate(msgs_list, axis=0)
    indices = jnp.concatenate(idx_list, axis=0)
    n = node_embeddings.shape[0]
    onehot = (jnp.arange(n)[:, None] == indices[None, :]).astype(c)
    sum_msg = jnp.dot(onehot, messages, preferred_element_type=jnp.float32)
    cnt = jnp.dot(onehot, jnp.ones((messages.shape[0], 1), c),
                  preferred_element_type=jnp.float32)
    avg = sum_msg / cnt
    uw1, ub1, uw2, ub2 = params["update"]
    h = _mish_fast(bdot(avg, uw1[:e]) + bdot(node_embeddings, uw1[e:]) + ub1,
                   approx_recip=False)
    return bdot(h, uw2) + ub2


if __name__ == "__main__":
    E = 32          # embedding_size
    N = 16          # number of nodes

    # Synthetic "domain": two predicates (arity 1, arity 2) and one action
    # (arity 2 -> relation arity 3), mirroring RelationMessagePassingBase.__init__.
    relation_arities = {
        "relation_p": 1,
        "relation_q_goal__true": 2,
        "action_0": 3,
    }

    key = jax.random.PRNGKey(0)
    key, k_emb = jax.random.split(key)
    node_embeddings = jax.random.normal(k_emb, (N, E), jnp.float32)

    # Flat index tensors, length = num_tuples * arity (as in PyTorch).
    relations = {
        "relation_p": jnp.arange(8, dtype=jnp.int32) % N,                    # 8 tuples, arity 1
        "relation_q_goal__true": (jnp.arange(12, dtype=jnp.int32) + 8) % N,  # 6 tuples, arity 2
        "action_0": (jnp.arange(12, dtype=jnp.int32) * 3) % N,               # 4 tuples, arity 3
    }

    params = init_params(jax.random.PRNGKey(1), E, relation_arities)
    params_padded = prepare_padded_params(params, relation_arities, E)

    out = mean_relation_message_passing(params_padded, relation_arities, E,
                                        node_embeddings, relations)
    out = jax.block_until_ready(out)

    # Tight check vs. a reference mirroring the kernels' bf16/fast-mish numerics
    # (slightly loosened for the approx-reciprocal in the in-kernel mish).
    mir = mirror_forward(params, relation_arities, E, node_embeddings, relations)
    np.testing.assert_allclose(np.asarray(out), np.asarray(mir), rtol=1e-2, atol=1e-2)

    # Semantic check vs. the pure-f32 PyTorch-mirroring reference (looser
    # tolerance: bf16 x / messages / MXU operands with f32 accumulation).
    ref = ref_forward(params, relation_arities, E, node_embeddings, relations)
    np.testing.assert_allclose(np.asarray(out), np.asarray(ref), rtol=5e-2, atol=5e-2)

    print("KERNEL_OK")
</pallas_src>

<mosaic_0001>
module attributes {stable_mosaic.version = 11 : i64} {
  func.func @_relation_mlp_kernel(%arg0: i32, %arg1: memref<16x384xbf16, #tpu.memory_space<vmem>>, %arg2: memref<384x128xbf16, #tpu.memory_space<vmem>>, %arg3: memref<1x128xf32, #tpu.memory_space<vmem>>, %arg4: memref<128x384xbf16, #tpu.memory_space<vmem>>, %arg5: memref<1x384xf32, #tpu.memory_space<vmem>>, %arg6: memref<16x384xbf16, #tpu.memory_space<vmem>>) attributes {dimension_semantics = [#tpu.dimension_semantics<parallel>], iteration_bounds = array<i64: 1>, scalar_prefetch = 0 : i64, scratch_operands = 0 : i64, tpu.core_type = #tpu.core_type<tc>, window_params = [{transform_indices = @transform_0, window_bounds = array<i64: 16, 384>}, {pipeline_mode = #tpu.pipeline_mode<synchronous>, transform_indices = @transform_1, window_bounds = array<i64: 384, 128>}, {pipeline_mode = #tpu.pipeline_mode<synchronous>, transform_indices = @transform_2, window_bounds = array<i64: 1, 128>}, {pipeline_mode = #tpu.pipeline_mode<synchronous>, transform_indices = @transform_3, window_bounds = array<i64: 128, 384>}, {pipeline_mode = #tpu.pipeline_mode<synchronous>, transform_indices = @transform_4, window_bounds = array<i64: 1, 384>}, {transform_indices = @transform_5, window_bounds = array<i64: 16, 384>}]} {
    %c0 = arith.constant 0 : index
    %c0_0 = arith.constant 0 : index
    %0 = vector.load %arg1[%c0, %c0_0] : memref<16x384xbf16, #tpu.memory_space<vmem>>, vector<16x384xbf16>
    %c0_1 = arith.constant 0 : index
    %c0_2 = arith.constant 0 : index
    %1 = vector.load %arg2[%c0_1, %c0_2] : memref<384x128xbf16, #tpu.memory_space<vmem>>, vector<384x128xbf16>
    %cst = arith.constant dense<0.000000e+00> : vector<16x128xf32>
    %2 = tpu.matmul %0, %1, %cst {dimension_numbers = #tpu.dot_dimension_numbers<[1], [0], [0], [1], [0, 0, 1, 1], [], []>} : vector<16x384xbf16>, vector<384x128xbf16>, vector<16x128xf32> -> vector<16x128xf32>
    %c0_3 = arith.constant 0 : index
    %c0_4 = arith.constant 0 : index
    %3 = vector.load %arg3[%c0_3, %c0_4] : memref<1x128xf32, #tpu.memory_space<vmem>>, vector<1x128xf32>
    %4 = vector.broadcast %3 : vector<1x128xf32> to vector<16x128xf32>
    %5 = arith.addf %2, %4 : vector<16x128xf32>
    %6 = math.exp %5 : vector<16x128xf32>
    %cst_5 = arith.constant 2.000000e+00 : f32
    %7 = vector.broadcast %cst_5 : f32 to vector<16x128xf32>
    %8 = arith.addf %6, %7 : vector<16x128xf32>
    %9 = arith.mulf %6, %8 : vector<16x128xf32>
    %cst_6 = arith.constant 2.000000e+00 : f32
    %10 = vector.broadcast %cst_6 : f32 to vector<16x128xf32>
    %11 = arith.addf %9, %10 : vector<16x128xf32>
    %12 = tpu.reciprocal %11 {approx = true} : vector<16x128xf32> -> vector<16x128xf32>
    %13 = arith.mulf %5, %9 : vector<16x128xf32>
    %14 = arith.mulf %13, %12 : vector<16x128xf32>
    %cst_7 = arith.constant 2.000000e+01 : f32
    %15 = vector.broadcast %cst_7 : f32 to vector<16x128xf32>
    %16 = arith.cmpf ogt, %5, %15 : vector<16x128xf32>
    %17 = arith.select %16, %5, %14 : vector<16x128xi1>, vector<16x128xf32>
    %18 = arith.truncf %17 : vector<16x128xf32> to vector<16x128xbf16>
    %c0_8 = arith.constant 0 : index
    %c0_9 = arith.constant 0 : index
    %19 = vector.load %arg4[%c0_8, %c0_9] : memref<128x384xbf16, #tpu.memory_space<vmem>>, vector<128x384xbf16>
    %cst_10 = arith.constant dense<0.000000e+00> : vector<16x384xf32>
    %20 = tpu.matmul %18, %19, %cst_10 {dimension_numbers = #tpu.dot_dimension_numbers<[1], [0], [0], [1], [0, 0, 1, 1], [], []>} : vector<16x128xbf16>, vector<128x384xbf16>, vector<16x384xf32> -> vector<16x384xf32>
    %c0_11 = arith.constant 0 : index
    %c0_12 = arith.constant 0 : index
    %21 = vector.load %arg5[%c0_11, %c0_12] : memref<1x384xf32, #tpu.memory_space<vmem>>, vector<1x384xf32>
    %22 = vector.broadcast %21 : vector<1x384xf32> to vector<16x384xf32>
    %23 = arith.addf %20, %22 : vector<16x384xf32>
    %24 = arith.extf %0 : vector<16x384xbf16> to vector<16x384xf32>
    %25 = arith.addf %23, %24 : vector<16x384xf32>
    %26 = arith.truncf %25 : vector<16x384xf32> to vector<16x384xbf16>
    %c0_13 = arith.constant 0 : index
    %c0_14 = arith.constant 0 : index
    %27 = vector.load %arg6[%c0_13, %c0_14] : memref<16x384xbf16, #tpu.memory_space<vmem>>, vector<16x384xbf16>
    tpu.vector_store %arg6[%c0_13, %c0_14], %26 {strides = array<i32>} : memref<16x384xbf16, #tpu.memory_space<vmem>>, vector<16x384xbf16>,
    return
  }
  func.func @transform_0(%arg0: i32) -> (i32, i32) {
    %c0_i32 = arith.constant 0 : i32
    %c0_i32_0 = arith.constant 0 : i32
    return %arg0, %c0_i32 : i32, i32
  }
  func.func @transform_1(%arg0: i32) -> (i32, i32) {
    %c0_i32 = arith.constant 0 : i32
    %c0_i32_0 = arith.constant 0 : i32
    %c0_i32_1 = arith.constant 0 : i32
    return %c0_i32, %c0_i32_0 : i32, i32
  }
  func.func @transform_2(%arg0: i32) -> (i32, i32) {
    %c0_i32 = arith.constant 0 : i32
    %c0_i32_0 = arith.constant 0 : i32
    %c0_i32_1 = arith.constant 0 : i32
    return %c0_i32, %c0_i32_0 : i32, i32
  }
  func.func @transform_3(%arg0: i32) -> (i32, i32) {
    %c0_i32 = arith.constant 0 : i32
    %c0_i32_0 = arith.constant 0 : i32
    %c0_i32_1 = arith.constant 0 : i32
    return %c0_i32, %c0_i32_0 : i32, i32
  }
  func.func @transform_4(%arg0: i32) -> (i32, i32) {
    %c0_i32 = arith.constant 0 : i32
    %c0_i32_0 = arith.constant 0 : i32
    %c0_i32_1 = arith.constant 0 : i32
    return %c0_i32, %c0_i32_0 : i32, i32
  }
  func.func @transform_5(%arg0: i32) -> (i32, i32) {
    %c0_i32 = arith.constant 0 : i32
    %c0_i32_0 = arith.constant 0 : i32
    return %arg0, %c0_i32 : i32, i32
  }
}

</mosaic_0001>

<bundles_post_ra>
// kernel: tpu_custom_call.1
= control target key start
LH: loop header
LB: loop body
LE: loop exit
PB: predicated region body
PF: predicated region fallthrough
CT: control target
= control target key end

     0   :  { %10 = vsyncpa [#allocation3], 0  ;;  %s1079_s0 = inlined_call_operand.hbm [shape: bf16[16,384], index: 0, kind: input, shape index: {}]   ;;  %s1080_s1 = inlined_call_operand.hbm [shape: bf16[384,128], index: 1, kind: input, shape index: {}]   ;;  %s1081_s2 = inlined_call_operand.hbm [shape: f32[1,128], index: 2, kind: input, shape index: {}]   ;;  %s1082_s3 = inlined_call_operand.hbm [shape: bf16[128,384], index: 3, kind: input, shape index: {}]   ;;  %s1083_s4 = inlined_call_operand.vmem [shape: f32[1,384], index: 4, kind: input, shape index: {}]   ;;  %s1084_s5 = inlined_call_operand.hbm [shape: bf16[16,384], index: 5, kind: output, shape index: {}]  }
   0x1   :  { %11 = vsyncpa [#allocation6], 0 }
   0x2   :  { %12 = vsyncpa [#allocation9], 0  ;;  %s31_s20 = sshll.u32 %s1080_s1, 4  ;;  %s32_s20 = int_to_ptr.hbm [resolvable:$true] %s31_s20 }
   0x3   :  { %13 = vsyncpa [#allocation4], 0  ;;  %s1013_s21 = smov [#allocation5]   ;;  %s18_s25 = sshll.u32 %s1079_s0, 4  ;;  %s19_s25 = int_to_ptr.hbm [resolvable:$true] %s18_s25 }
   0x4   :  { %s33_s22 = sshll.u32 %s1013_s21, 4  ;;  %s1014_s26 = smov 64   ;;  %s34_s22 = int_to_ptr.vmem [resolvable:$true] %s33_s22 }
   0x5   :  { %s1015_s27 = smov 4   ;;  %s1016_s28 = smov [#allocation2]  }
   0x6   :  { %39 = dma.hbm_to_vmem [thread:$0]  %s32_s20, 3072, %s34_s22, [#allocation6], %s1014_s26, %s1014_s26, %s1015_s27  }
   0x7   :  { %s20_s29 = sshll.u32 %s1016_s28, 4  ;;  %s1017_s30 = smov 192   ;;  %s21_s29 = int_to_ptr.vmem [resolvable:$true] %s20_s29 }
   0x8   :  { %s1018_s6 = smov 12   ;;  %s45_s8 = sshll.u32 %s1081_s2, 4  ;;  %s46_s8 = int_to_ptr.hbm [resolvable:$true] %s45_s8 }
   0x9   :  { %26 = dma.hbm_to_vmem [thread:$0]  %s19_s25, 384, %s21_s29, [#allocation3], %s1017_s30, %s1017_s30, %s1018_s6  }
   0xa   :  { %s1019_s9 = smov [#allocation7]   ;;  %s55_s12 = sshll.u32 %s1082_s3, 4  ;;  %s56_s12 = int_to_ptr.hbm [resolvable:$true] %s55_s12 }
   0xb   :  { %s47_s0 = sshll.u32 %s1019_s9, 4  ;;  %s1020_s13 = smov [#allocation8]   ;;  %s48_s0 = int_to_ptr.vmem [resolvable:$true] %s47_s0 }
   0xc   :  { %50 = dma.hbm_to_vmem [thread:$0]  %s46_s8, 16, %s48_s0, [#allocation6]  }
   0xd   :  { %s57_s14 = sshll.u32 %s1020_s13, 4  ;;  %s58_s14 = int_to_ptr.vmem [resolvable:$true] %s57_s14 }
   0xe   :  { %63 = dma.hbm_to_vmem [thread:$0]  %s56_s12, 3072, %s58_s14, [#allocation9], %s1017_s30, %s1017_s30, %s1018_s6  }
   0xf   :  { %1005 = dma.done.wait [#allocation3], 384  }
  0x10   :  { %1006 = vsyncadd [#allocation3], 4294966912 }
  0x11   :  { %1007 = dma.done.wait [#allocation6], 3088  }
  0x12   :  { %1008 = vsyncadd [#allocation6], 4294964208 }
  0x13   :  { %1009 = dma.done.wait [#allocation9], 3072  }
  0x14   :  { %1010 = vsyncadd [#allocation9], 4294964224  ;;  %v826_v0 = vld [vmem:[#allocation5 + $0x38] sm:$0xff]  ;;  %v825_v3 = vld [vmem:[#allocation5 + $0x30] sm:$0xff]  ;;  %s597_s18 = sshll.u32 %s1084_s5, 4  ;;  %s598_s18 = int_to_ptr.hbm [resolvable:$true] %s597_s18 }
  0x15   :  { %v834_v1 = vld [vmem:[#allocation5 + $0x78] sm:$0xff]  ;;  %298 = vmatpush.bf16.msra.mxu0 %v826_v0  ;;  %v833_v4 = vld [vmem:[#allocation5 + $0x70] sm:$0xff]  ;;  %v824_v6 = vld [vmem:[#allocation5 + $0x28] sm:$0xff] }
  0x16   :  { %v842_v2 = vld [vmem:[#allocation5 + $0xb8] sm:$0xff]  ;;  %312 = vmatpush.bf16.msra.mxu1 %v834_v1  ;;  %v841_v5 = vld [vmem:[#allocation5 + $0xb0] sm:$0xff]  ;;  %v832_v7 = vld [vmem:[#allocation5 + $0x68] sm:$0xff] }
  0x17   :  { %326 = vmatpush.bf16.msra.mxu2 %v842_v2  ;;  %v840_v8 = vld [vmem:[#allocation5 + $0xa8] sm:$0xff]  ;;  %v823_v9 = vld [vmem:[#allocation5 + $0x20] sm:$0xff]  ;;  %v822_v12 = vld [vmem:[#allocation5 + $0x18] sm:$0xff] }
  0x18   :  { %v831_v10 = vld [vmem:[#allocation5 + $0x60] sm:$0xff]  ;;  %v830_v13 = vld [vmem:[#allocation5 + $0x58] sm:$0xff]  ;;  %v821_v15 = vld [vmem:[#allocation5 + $0x10] sm:$0xff] }
  0x19   :  { %299 = vmatpush.bf16.msra.mxu0 %v825_v3  ;;  %v839_v11 = vld [vmem:[#allocation5 + $0xa0] sm:$0xff]  ;;  %v838_v14 = vld [vmem:[#allocation5 + $0x98] sm:$0xff]  ;;  %v829_v16 = vld [vmem:[#allocation5 + $0x50] sm:$0xff] }
  0x1a   :  { %313 = vmatpush.bf16.msra.mxu1 %v833_v4  ;;  %v837_v17 = vld [vmem:[#allocation5 + $0x90] sm:$0xff]  ;;  %v820_v18 = vld [vmem:[#allocation5 + $0x8] sm:$0xff]  ;;  %v819_v21 = vld [vmem:[#allocation5] sm:$0xff] }
  0x1b   :  { %327 = vmatpush.bf16.msra.mxu2 %v841_v5  ;;  %v828_v19 = vld [vmem:[#allocation5 + $0x48] sm:$0xff]  ;;  %v827_v22 = vld [vmem:[#allocation5 + $0x40] sm:$0xff]  ;;  %v817_v24 = vld [vmem:[#allocation2 + $0x8] sm:$0xf0] }
  0x1c   :  { %v836_v20 = vld [vmem:[#allocation5 + $0x88] sm:$0xff]  ;;  %v616_v26 = vld [vmem:[#allocation2 + $0xc] sm:$0xf0]  ;;  %v835_v27 = vld [vmem:[#allocation5 + $0x80] sm:$0xff] }
  0x1d   :  { %300 = vmatpush.bf16.msra.mxu0 %v824_v6  ;;  %v614_v23 = vld [vmem:[#allocation2] sm:$0xf]  ;;  %v816_v25 = vld [vmem:[#allocation2 + $0x4] sm:$0xf]  ;;  %v622_v28 = vld [vmem:[#allocation2 + $0x8] sm:$0xf] }
  0x1e   :  { %314 = vmatpush.bf16.msra.mxu1 %v832_v7  ;;  %v818_v29 = vld [vmem:[#allocation2 + $0x10] sm:$0xf0]  ;;  %v615_v30 = vor.u32 %v817_v24, %v614_v23  ;;  %v619_v31 = vor.u32 %v816_v25, %v616_v26  ;;  %v806_v33 = vld [vmem:[#allocation8 + $0xa8] sm:$0xf]  ;;  %v865_v34 = vld [vmem:[#allocation8 + $0xb0] sm:$0xf0] }
  0x1f   :  { %328 = vmatpush.bf16.msra.mxu2 %v840_v8  ;;  %v623_v32 = vor.u32 %v818_v29, %v622_v28  ;;  %v864_v35 = vld [vmem:[#allocation8 + $0xac] sm:$0xf]  ;;  %v807_v36 = vor.u32 %v865_v34, %v806_v33  ;;  %v808_v37 = vld [vmem:[#allocation8 + $0xb4] sm:$0xf0]  ;;  %v814_v38 = vld [vmem:[#allocation8 + $0xb0] sm:$0xf] }
  0x20   :  { %v866_v39 = vld [vmem:[#allocation8 + $0xb8] sm:$0xf0]  ;;  %v811_v40 = vor.u32 %v864_v35, %v808_v37  ;;  %v794_v42 = vld [vmem:[#allocation8 + $0x90] sm:$0xf]  ;;  %v861_v44 = vld [vmem:[#allocation8 + $0x94] sm:$0xf] }
  0x21   :  { %301 = vmatpush.bf16.msra.mxu0 %v823_v9  ;;  %v815_v41 = vor.u32 %v866_v39, %v814_v38  ;;  %529 = vmatpush.bf16.msra.mxu3 %v807_v36  ;;  %v862_v43 = vld [vmem:[#allocation8 + $0x98] sm:$0xf0]  ;;  %v796_v46 = vld [vmem:[#allocation8 + $0x9c] sm:$0xf0]  ;;  %v802_v47 = vld [vmem:[#allocation8 + $0x98] sm:$0xf] }
  0x22   :  { %315 = vmatpush.bf16.msra.mxu1 %v831_v10  ;;  %v795_v45 = vor.u32 %v862_v43, %v794_v42  ;;  %v863_v48 = vld [vmem:[#allocation8 + $0xa0] sm:$0xf0]  ;;  %v799_v49 = vor.u32 %v861_v44, %v796_v46  ;;  %v782_v51 = vld [vmem:[#allocation8 + $0x78] sm:$0xf]  ;;  %v858_v53 = vld [vmem:[#allocation8 + $0x7c] sm:$0xf] }
  0x23   :  { %329 = vmatpush.bf16.msra.mxu2 %v839_v11  ;;  %v803_v50 = vor.u32 %v863_v48, %v802_v47  ;;  %v859_v52 = vld [vmem:[#allocation8 + $0x80] sm:$0xf0]  ;;  %v784_v55 = vld [vmem:[#allocation8 + $0x84] sm:$0xf0]  ;;  %v790_v56 = vld [vmem:[#allocation8 + $0x80] sm:$0xf] }
  0x24   :  { %v783_v54 = vor.u32 %v859_v52, %v782_v51  ;;  %v860_v57 = vld [vmem:[#allocation8 + $0x88] sm:$0xf0]  ;;  %v787_v58 = vor.u32 %v858_v53, %v784_v55  ;;  %v770_v60 = vld [vmem:[#allocation8 + $0x60] sm:$0xf]  ;;  %v855_v62 = vld [vmem:[#allocation8 + $0x64] sm:$0xf] }
  0x25   :  { %302 = vmatpush.bf16.msra.mxu0 %v822_v12  ;;  %530 = vmatpush.bf16.msra.mxu3 %v795_v45  ;;  %v791_v59 = vor.u32 %v860_v57, %v790_v56  ;;  %v856_v61 = vld [vmem:[#allocation8 + $0x68] sm:$0xf0]  ;;  %v772_v0 = vld [vmem:[#allocation8 + $0x6c] sm:$0xf0]  ;;  %v778_v1 = vld [vmem:[#allocation8 + $0x68] sm:$0xf] }
  0x26   :  { %316 = vmatpush.bf16.msra.mxu1 %v830_v13  ;;  %v771_v63 = vor.u32 %v856_v61, %v770_v60  ;;  %v857_v2 = vld [vmem:[#allocation8 + $0x70] sm:$0xf0]  ;;  %v775_v3 = vor.u32 %v855_v62, %v772_v0  ;;  %v758_v5 = vld [vmem:[#allocation8 + $0x48] sm:$0xf]  ;;  %v852_v7 = vld [vmem:[#allocation8 + $0x4c] sm:$0xf] }
  0x27   :  { %330 = vmatpush.bf16.msra.mxu2 %v838_v14  ;;  %v779_v4 = vor.u32 %v857_v2, %v778_v1  ;;  %v853_v6 = vld [vmem:[#allocation8 + $0x50] sm:$0xf0]  ;;  %v760_v9 = vld [vmem:[#allocation8 + $0x54] sm:$0xf0]  ;;  %v766_v10 = vld [vmem:[#allocation8 + $0x50] sm:$0xf] }
  0x28   :  { %v759_v8 = vor.u32 %v853_v6, %v758_v5  ;;  %v854_v11 = vld [vmem:[#allocation8 + $0x58] sm:$0xf0]  ;;  %v763_v13 = vor.u32 %v852_v7, %v760_v9  ;;  %v734_v26 = vld [vmem:[#allocation8 + $0x18] sm:$0xf]  ;;  %v722_v36 = vld [vmem:[#allocation8] sm:$0xf] }
  0x29   :  { %303 = vmatpush.bf16.msra.mxu0 %v821_v15  ;;  %531 = vmatpush.bf16.msra.mxu3 %v783_v54  ;;  %v876_v12 = vld [vmem:[#allocation7] ss:$0 sm:$0xff]  ;;  %v767_v14 = vor.u32 %v854_v11, %v766_v10  ;;  %v746_v15 = vld [vmem:[#allocation8 + $0x30] sm:$0xf]  ;;  %v844_v37 = vld [vmem:[#allocation8 + $0x8] sm:$0xf0] }
  0x2a   :  { %317 = vmatpush.bf16.msra.mxu1 %v829_v16  ;;  %v850_v16 = vld [vmem:[#allocation8 + $0x38] sm:$0xf0]  ;;  %v843_v38 = vld [vmem:[#allocation8 + $0x4] sm:$0xf]  ;;  %v845_v42 = vld [vmem:[#allocation8 + $0x10] sm:$0xf0]  ;;  %v723_v43 = vor.u32 %v844_v37, %v722_v36 }
  0x2b   :  { %331 = vmatpush.bf16.msra.mxu2 %v837_v17  ;;  %v849_v17 = vld [vmem:[#allocation8 + $0x34] sm:$0xf]  ;;  %v846_v28 = vld [vmem:[#allocation8 + $0x1c] sm:$0xf]  ;;  %v393_v9 = vld [vmem:[%s1083_s4] sm:$0x7] }
  0x2c   :  { %v83_v10 = vld [vmem:[#allocation2 + $0x8] sm:$0xf]  ;;  %v397_v11 = vperm.slane %v393_v9, 2  ;;  %s1021_s4 = smov [#allocation10]  }
  0x2d   :  { %304 = vmatpush.bf16.msra.mxu0 %v820_v18  ;;  %532 = vmatpush.bf16.msra.mxu3 %v771_v63  ;;  %s595_s15 = sshll.u32 %s1021_s4, 4  ;;  %s596_s15 = int_to_ptr.vmem [resolvable:$true] %s595_s15 }
  0x2e   :  { %318 = vmatpush.bf16.msra.mxu1 %v828_v19  ;;  %v747_v19 = vor.u32 %v850_v16, %v746_v15  ;;  %v82_v16 = vld [vmem:[#allocation2] sm:$0xff] }
  0x2f   :  { %332 = vmatpush.bf16.msra.mxu2 %v836_v20  ;;  %v748_v20 = vld [vmem:[#allocation8 + $0x3c] sm:$0xf0] }
  0x30   :  { %v751_v24 = vor.u32 %v849_v17, %v748_v20 }
  0x31   :  { %305 = vmatpush.bf16.msra.mxu0 %v819_v21  ;;  %533 = vmatpush.bf16.msra.mxu3 %v759_v8  ;;  %v754_v21 = vld [vmem:[#allocation8 + $0x38] sm:$0xf] }
  0x32   :  { %319 = vmatpush.bf16.msra.mxu1 %v827_v22  ;;  %v851_v22 = vld [vmem:[#allocation8 + $0x40] sm:$0xf0] }
  0x33   :  { %333 = vmatpush.bf16.msra.mxu2 %v835_v27  ;;  %v755_v25 = vor.u32 %v851_v22, %v754_v21  ;;  %v847_v27 = vld [vmem:[#allocation8 + $0x20] sm:$0xf0]  ;;  %v572_v21 = vunpack.c.h.bf16 %v82_v16  ;;  %v571_v22 = vunpack.c.l.bf16 %v82_v16 }
  0x34   :  { %306 = vmatmul.bf16.vlgmr.msra.gmra.mxu0 %v615_v30  ;;  %v735_v29 = vor.u32 %v847_v27, %v734_v26  ;;  %v736_v30 = vld [vmem:[#allocation8 + $0x24] sm:$0xf0] }
  0x35   :  { %320 = vmatmul.bf16.vlgmr.msra.gmra.mxu1 %v619_v31  ;;  %543 = vmatpush.bf16.msrb.mxu0 %v811_v40  ;;  %v742_v31 = vld [vmem:[#allocation8 + $0x20] sm:$0xf]  ;;  %v739_v34 = vor.u32 %v846_v28, %v736_v30  ;;  %v724_v40 = vld [vmem:[#allocation8 + $0xc] sm:$0xf0] }
  0x36   :  { %334 = vmatmul.bf16.vlgmr.msra.gmra.mxu2 %v623_v32  ;;  %557 = vmatpush.bf16.msrb.mxu1 %v815_v41  ;;  %v848_v32 = vld [vmem:[#allocation8 + $0x28] sm:$0xf0]  ;;  %v730_v41 = vld [vmem:[#allocation8 + $0x8] sm:$0xf]  ;;  %v727_v45 = vor.u32 %v843_v38, %v724_v40 }
  0x37   :  { %534 = vmatpush.bf16.msra.mxu3 %v747_v19  ;;  %v743_v35 = vor.u32 %v848_v32, %v742_v31  ;;  %v731_v46 = vor.u32 %v845_v42, %v730_v41  ;;  %v84_v31 = vld [vmem:[#allocation2 + $0xc] sm:$0xff] }
  0x38   :  { %v575_v37 = vunpack.c.h.bf16 %v84_v31  ;;  %v574_v38 = vunpack.c.l.bf16 %v84_v31 }
  0x39   :  { %544 = vmatpush.bf16.msrb.mxu0 %v799_v49 }
  0x3a   :  { %558 = vmatpush.bf16.msrb.mxu1 %v803_v50 }
  0x3b   :  { %535 = vmatpush.bf16.msra.mxu3 %v735_v29 }
  0x3d   :  { %545 = vmatpush.bf16.msrb.mxu0 %v787_v58 }
  0x3e   :  { %559 = vmatpush.bf16.msrb.mxu1 %v791_v59 }
  0x3f   :  { %536 = vmatpush.bf16.msra.mxu3 %v723_v43 }
  0x41   :  { %546 = vmatpush.bf16.msrb.mxu0 %v775_v3 }
  0x42   :  { %560 = vmatpush.bf16.msrb.mxu1 %v779_v4 }
  0x45   :  { %547 = vmatpush.bf16.msrb.mxu0 %v763_v13  ;;  %v573_v13 = vunpack.c.l.bf16 %v83_v10 }
  0x46   :  { %561 = vmatpush.bf16.msrb.mxu1 %v767_v14  ;;  %v396_v14 = vperm.slane %v393_v9, 1 }
  0x49   :  { %548 = vmatpush.bf16.msrb.mxu0 %v751_v24 }
  0x4a   :  { %562 = vmatpush.bf16.msrb.mxu1 %v755_v25 }
  0x4d   :  { %549 = vmatpush.bf16.msrb.mxu0 %v739_v34 }
  0x4e   :  { %563 = vmatpush.bf16.msrb.mxu1 %v743_v35 }
  0x51   :  { %550 = vmatpush.bf16.msrb.mxu0 %v727_v45 }
  0x52   :  { %564 = vmatpush.bf16.msrb.mxu1 %v731_v46 }
  0xb1   :  { %v307_v18 = vpop.f32.mrf.mxu0 }
  0xb2   :  { %v308_v23 = vadd.f32 %v876_v12, %v307_v18  ;;  %v321_v33 = vpop.f32.mrf.mxu1  ;;  %v395_v18 = vperm.slane %v393_v9, 0 }
  0xb4   :  { %v322_v39 = vadd.f32 %v321_v33, %v308_v23  ;;  %v85_v23 = vld [vmem:[#allocation2 + $0x14] sm:$0xf] }
  0xb5   :  { %v576_v27 = vunpack.c.l.bf16 %v85_v23 }
  0xb9   :  { %v335_v44 = vpop.f32.mrf.mxu2  ;;  %v309_v48 = vpop.f32.mrf.mxu0 }
  0xba   :  { %v336_v47 = vadd.f32 %v335_v44, %v322_v39  ;;  %v310_v50 = vadd.f32 %v876_v12, %v309_v48  ;;  %v323_v51 = vpop.f32.mrf.mxu1 }
  0xbc   :  { %v340_v49 = vmul.f32 1.442695, %v336_v47  ;;  %v324_v52 = vadd.f32 %v323_v51, %v310_v50  ;;  %vm356_vm0 = vcmp.gt.f32.partialorder %v336_v47, 20.0 }
  0xbe   :  { %877 = vpow2.f32 %v340_v49 }
  0xc1   :  { %v337_v53 = vpop.f32.mrf.mxu2 }
  0xc2   :  { %v338_v54 = vadd.f32 %v337_v53, %v324_v52 }
  0xc4   :  { %v878_v55 = vpop.eup %877  ;;  %v342_v56 = vmul.f32 1.442695, %v338_v54  ;;  %vm357_vm1 = vcmp.gt.f32.partialorder %v338_v54, 20.0 }
  0xc5   :  { %v344_v57 = vadd.f32 2.0, %v878_v55 }
  0xc6   :  { %879 = vpow2.f32 %v342_v56 }
  0xc7   :  { %v346_v58 = vmul.f32 %v878_v55, %v344_v57 }
  0xc9   :  { %v348_v59 = vadd.f32 2.0, %v346_v58  ;;  %v352_v1 = vmul.f32 %v346_v58, %v336_v47 }
  0xcb   :  { %881 = vrcp.f32 %v348_v59 }
  0xcc   :  { %v880_v60 = vpop.eup %879 }
  0xcd   :  { %v345_v61 = vadd.f32 2.0, %v880_v60 }
  0xcf   :  { %v347_v62 = vmul.f32 %v880_v60, %v345_v61 }
  0xd1   :  { %v349_v63 = vadd.f32 2.0, %v347_v62  ;;  %v882_v0 = vpop.eup %881  ;;  %v353_v2 = vmul.f32 %v347_v62, %v338_v54 }
  0xd2   :  { %v354_v3 = vmul.f32 %v882_v0, %v352_v1 }
  0xd3   :  { %883 = vrcp.f32 %v349_v63 }
  0xd4   :  { %v358_v6 = vsel %vm356_vm0, %v336_v47, %v354_v3 }
  0xd9   :  { %v884_v4 = vpop.eup %883 }
  0xda   :  { %v355_v5 = vmul.f32 %v884_v4, %v353_v2 }
  0xdc   :  { %v359_v7 = vsel %vm357_vm1, %v338_v54, %v355_v5 }
  0xdd   :  { %v360_v8 = vpack.c.bf16 %v359_v7, %v358_v6 }
  0xdf   :  { %537 = vmatmul.bf16.vlgmr.msra.gmra.mxu3 %v360_v8  ;;  %551 = vmatmul.bf16.vlgmr.msrb.gmra.mxu0 %v360_v8 }
  0xe0   :  { %565 = vmatmul.bf16.vlgmr.msrb.gmra.mxu1 %v360_v8 }
 0x15c   :  { %v552_v12 = vpop.f32.mrf.mxu0 }
 0x15d   :  { %v566_v15 = vpop.f32.mrf.mxu1  ;;  %v553_v20 = vadd.f32 %v552_v12, %v396_v14 }
 0x15e   :  { %v567_v17 = vadd.f32 %v566_v15, %v397_v11 }
 0x15f   :  { %v578_v28 = vadd.f32 %v572_v21, %v553_v20 }
 0x160   :  { %v579_v19 = vadd.f32 %v573_v13, %v567_v17 }
 0x162   :  { %v584_v24 = vpack.c.bf16 %v579_v19, %v579_v19  ;;  %v538_v25 = vpop.f32.mrf.mxu3 }
 0x163   :  { %v539_v26 = vadd.f32 %v538_v25, %v395_v18 }
 0x164   :  { %588 = vst [vmem:[#allocation10 + $0x8] sm:$0xf] %v584_v24  ;;  %v554_v32 = vpop.f32.mrf.mxu0 }
 0x165   :  { %v577_v29 = vadd.f32 %v571_v22, %v539_v26  ;;  %v568_v30 = vpop.f32.mrf.mxu1  ;;  %v555_v36 = vadd.f32 %v554_v32, %v396_v14 }
 0x166   :  { %v569_v33 = vadd.f32 %v568_v30, %v397_v11 }
 0x167   :  { %v583_v34 = vpack.c.bf16 %v578_v28, %v577_v29  ;;  %v581_v42 = vadd.f32 %v575_v37, %v555_v36 }
 0x168   :  { %v582_v35 = vadd.f32 %v576_v27, %v569_v33 }
 0x169   :  { %587 = vst [vmem:[#allocation10] sm:$0xff] %v583_v34 }
 0x16a   :  { %v586_v39 = vpack.c.bf16 %v582_v35, %v582_v35  ;;  %v540_v40 = vpop.f32.mrf.mxu3 }
 0x16b   :  { %v541_v41 = vadd.f32 %v540_v40, %v395_v18 }
 0x16c   :  { %590 = vst [vmem:[#allocation10 + $0x14] sm:$0xf] %v586_v39 }
 0x16d   :  { %v580_v43 = vadd.f32 %v574_v38, %v541_v41 }
 0x16f   :  { %v585_v44 = vpack.c.bf16 %v581_v42, %v580_v43 }
 0x171   :  { %589 = vst [vmem:[#allocation10 + $0xc] sm:$0xff] %v585_v44 }
 0x172   :  { %603 = dma.vmem_to_hbm [thread:$0]  %s596_s15, 384, %s598_s18, [#allocation4], %s1017_s30, %s1017_s30, %s1018_s6  }
 0x173   :  { %1011 = dma.done.wait [#allocation4], 384  }
 0x174   :  { %1012 = vsyncadd [#allocation4], 4294966912 }
 0x175   :  { %608 = vsyncpa [#allocation3], 1 }
 0x176   :  { %609 = vsyncpa [#allocation6], 1 }
 0x177   :  { %610 = vsyncpa [#allocation9], 1 }
 0x178   :  { %611 = vsyncpa [#allocation4], 1 }

</bundles_post_ra>
